<compile_context>
chip_gen: v5e
topology: v5e:2x2
jax: 0.10.0
libtpu: 0.0.40
codegen_flags: <defaults>
</compile_context>

<pallas_src>
import functools

import jax
import jax.numpy as jnp
from jax.experimental import pallas as pl
from jax.experimental.pallas import tpu as pltpu


def _mc_loss_kernel(score_ref, target_ref, out_ref, acc_ref, *,
                    margin, size_average, n_valid, tile_n):
    pid = pl.program_id(0)
    last = pl.num_programs(0) - 1

    @pl.when(pid == 0)
    def _():
        acc_ref[0, 0] = jnp.float32(0.0)

    score = score_ref[...].astype(jnp.float32)      # (C, TILE_N)
    tgt = target_ref[...]                           # (1, TILE_N) int32
    C = score.shape[0]

    # One-hot of the correct choice along the (sublane) choice axis.
    # Note: targets outside [0, C) yield an all-zero "correct" score, same as
    # the previous kernel / the vectorized reference.
    choice_idx = jax.lax.broadcasted_iota(jnp.int32, score.shape, 0)
    is_correct = choice_idx == tgt                  # (C, TILE_N) bool

    # score[b, target[b]] broadcast back over choices (reduce over choice axis)
    correct = jnp.sum(jnp.where(is_correct, score, 0.0), axis=0, keepdims=True)

    # Mask lanes that are padding past the real batch size.
    lane_idx = jax.lax.broadcasted_iota(jnp.int32, score.shape, 1)
    valid = (pid * tile_n + lane_idx) < n_valid

    # hinge: max(0, margin + score[b, c] - score[b, c0]); single fused select
    # drops both the c == c0 terms and the padded lanes.
    hinge = jnp.maximum(0.0, margin + score - correct)
    hinge = jnp.where(jnp.logical_and(valid, jnp.logical_not(is_correct)),
                      hinge, 0.0)

    acc_ref[0, 0] += jnp.sum(hinge)

    @pl.when(pid == last)
    def _():
        total = acc_ref[0, 0]
        cnt = n_valid * (C - 1)
        if size_average and cnt > 0:
            total = total / jnp.float32(cnt)
        out_ref[0, 0] = total


def _round_up(x, m):
    return ((x + m - 1) // m) * m


def multiple_choice_loss(score, target, margin=1.0, size_average=True,
                         tile_n=8192):
    """score: (N, C) float (f32/bf16/fp16), target: (N,) int.

    Returns scalar float32 loss identical to the PyTorch MultipleChoiceLoss
    forward pass.
    """
    N, C = score.shape
    if C <= 1 or N == 0:
        # cnt == 0 path of the reference module
        return jnp.float32(0.0)

    # Lane-dense tiling: N on the lane axis, tile multiple of 128.
    # Tile bytes stay tiny (C * tile_n * itemsize), well under the v7x
    # 32 MiB default scoped-VMEM budget even with double buffering.
    tile_n = min(int(tile_n), _round_up(N, 128))
    n_pad = _round_up(N, tile_n)
    grid_n = n_pad // tile_n

    # Wrapper-side layout plumbing only -- no dtype upcast in HBM.
    score_t = jnp.transpose(score, (1, 0))                           # (C, N)
    score_t = jnp.pad(score_t, ((0, 0), (0, n_pad - N)))
    target_row = jnp.pad(target.astype(jnp.int32).reshape(1, N),
                         ((0, 0), (0, n_pad - N)), constant_values=-1)

    kernel = functools.partial(
        _mc_loss_kernel,
        margin=float(margin),
        size_average=bool(size_average),
        n_valid=N,
        tile_n=tile_n,
    )

    bytes_accessed = n_pad * C * score.dtype.itemsize + n_pad * 4 + 4

    out = pl.pallas_call(
        kernel,
        out_shape=jax.ShapeDtypeStruct((1, 1), jnp.float32),
        grid=(grid_n,),
        in_specs=[
            pl.BlockSpec((C, tile_n), lambda i: (0, i)),   # score (C, N_pad)
            pl.BlockSpec((1, tile_n), lambda i: (0, i)),   # target (1, N_pad)
        ],
        out_specs=pl.BlockSpec((1, 1), lambda i: (0, 0),
                               memory_space=pltpu.SMEM),
        scratch_shapes=[pltpu.SMEM((1, 1), jnp.float32)],  # running sum
        compiler_params=pltpu.CompilerParams(
            dimension_semantics=("arbitrary",)),
        cost_estimate=pl.CostEstimate(
            flops=5 * n_pad * C, transcendentals=0,
            bytes_accessed=int(bytes_accessed)),
    )(score_t, target_row)
    # TODO(synk): optional 2-TensorCore split on v7x (leading parallel axis +
    # per-core partial sums) is not implemented; single-TC streaming is used.
    return out[0, 0]


def _reference_loss(score, target, margin=1.0, size_average=True):
    N, C = score.shape
    score = score.astype(jnp.float32)
    col = jnp.arange(C)[None, :]
    is_correct = col == target[:, None]
    correct = jnp.sum(jnp.where(is_correct, score, 0.0), axis=1, keepdims=True)
    hinge = jnp.maximum(0.0, margin + score - correct)
    hinge = jnp.where(is_correct, 0.0, hinge)
    total = jnp.sum(hinge)
    cnt = N * (C - 1)
    if cnt == 0:
        return jnp.float32(0.0)
    return total / cnt if size_average else total


if __name__ == "__main__":
    key = jax.random.PRNGKey(0)

    # Small case matching the module's typical shapes.
    k1, k2, k3, k4 = jax.random.split(key, 4)
    N, C = 2, 4
    score = jax.random.normal(k1, (N, C), dtype=jnp.float32)
    target = jax.random.randint(k2, (N,), 0, C, dtype=jnp.int32)

    loss = multiple_choice_loss(score, target, margin=1.0, size_average=True)
    loss = jax.block_until_ready(loss)
    ref = _reference_loss(score, target, margin=1.0, size_average=True)
    assert jnp.allclose(loss, ref, atol=1e-5), (loss, ref)

    # Multi-tile case (exercises the grid, padding mask and accumulator).
    N2, C2 = 300, 4
    score2 = jax.random.normal(k3, (N2, C2), dtype=jnp.float32)
    target2 = jax.random.randint(k4, (N2,), 0, C2, dtype=jnp.int32)

    loss2 = multiple_choice_loss(score2, target2, margin=1.0,
                                 size_average=True, tile_n=128)
    loss2 = jax.block_until_ready(loss2)
    ref2 = _reference_loss(score2, target2, margin=1.0, size_average=True)
    assert jnp.allclose(loss2, ref2, atol=1e-5), (loss2, ref2)

    # size_average=False path.
    loss3 = multiple_choice_loss(score2, target2, margin=1.0,
                                 size_average=False, tile_n=128)
    loss3 = jax.block_until_ready(loss3)
    ref3 = _reference_loss(score2, target2, margin=1.0, size_average=False)
    assert jnp.allclose(loss3, ref3, atol=1e-3), (loss3, ref3)

    print("KERNEL_OK")
</pallas_src>

<mosaic_0001>
module attributes {stable_mosaic.version = 11 : i64} {
  func.func @_mc_loss_kernel(%arg0: i32, %arg1: memref<4x128xf32, #tpu.memory_space<vmem>>, %arg2: memref<1x128xi32, #tpu.memory_space<vmem>>, %arg3: memref<1x1xf32, #tpu.memory_space<smem>>, %arg4: memref<1x1xf32, #tpu.memory_space<smem>>) attributes {dimension_semantics = [#tpu.dimension_semantics<arbitrary>], iteration_bounds = array<i64: 1>, scalar_prefetch = 0 : i64, scratch_operands = 1 : i64, tpu.core_type = #tpu.core_type<tc>, window_params = [{transform_indices = @transform_0, window_bounds = array<i64: 4, 128>}, {transform_indices = @transform_1, window_bounds = array<i64: 1, 128>}, {transform_indices = @transform_2, window_bounds = array<i64: 1, 1>}]} {
    %c0_i32 = arith.constant 0 : i32
    %0 = arith.cmpi eq, %arg0, %c0_i32 : i32
    %1 = arith.extui %0 : i1 to i32
    %c0_i32_0 = arith.constant 0 : i32
    %2 = arith.cmpi ne, %1, %c0_i32_0 : i32
    scf.if %2 {
      %cst_16 = arith.constant 0.000000e+00 : f32
      %c0_17 = arith.constant 0 : index
      %c0_18 = arith.constant 0 : index
      %38 = memref.load %arg4[%c0_17, %c0_18] : memref<1x1xf32, #tpu.memory_space<smem>>
      memref.store %cst_16, %arg4[%c0_17, %c0_18] : memref<1x1xf32, #tpu.memory_space<smem>>
    } else {
    }
    %c0 = arith.constant 0 : index
    %c0_1 = arith.constant 0 : index
    %3 = vector.load %arg1[%c0, %c0_1] : memref<4x128xf32, #tpu.memory_space<vmem>>, vector<4x128xf32>
    %c0_2 = arith.constant 0 : index
    %c0_3 = arith.constant 0 : index
    %4 = vector.load %arg2[%c0_2, %c0_3] : memref<1x128xi32, #tpu.memory_space<vmem>>, vector<1x128xi32>
    %5 = tpu.iota {dimensions = array<i32: 0>} : vector<4x128xi32>
    %6 = vector.broadcast %4 : vector<1x128xi32> to vector<4x128xi32>
    %7 = arith.cmpi eq, %5, %6 : vector<4x128xi32>
    %cst = arith.constant 0.000000e+00 : f32
    %8 = vector.broadcast %cst : f32 to vector<4x128xf32>
    %9 = arith.select %7, %3, %8 : vector<4x128xi1>, vector<4x128xf32>
    %cst_4 = arith.constant dense<0.000000e+00> : vector<128xf32>
    %10 = vector.multi_reduction <add>, %9, %cst_4 [0] : vector<4x128xf32> to vector<128xf32>
    %11 = vector.shape_cast %10 : vector<128xf32> to vector<1x128xf32>
    %12 = tpu.iota {dimensions = array<i32: 1>} : vector<4x128xi32>
    %c128_i32 = arith.constant 128 : i32
    %13 = arith.muli %arg0, %c128_i32 : i32
    %14 = vector.broadcast %13 : i32 to vector<4x128xi32>
    %15 = arith.addi %14, %12 : vector<4x128xi32>
    %c2_i32 = arith.constant 2 : i32
    %16 = vector.broadcast %c2_i32 : i32 to vector<4x128xi32>
    %17 = arith.cmpi slt, %15, %16 : vector<4x128xi32>
    %cst_5 = arith.constant 1.000000e+00 : f32
    %18 = vector.broadcast %cst_5 : f32 to vector<4x128xf32>
    %19 = arith.addf %18, %3 : vector<4x128xf32>
    %20 = vector.broadcast %11 : vector<1x128xf32> to vector<4x128xf32>
    %21 = arith.subf %19, %20 : vector<4x128xf32>
    %cst_6 = arith.constant 0.000000e+00 : f32
    %22 = vector.broadcast %cst_6 : f32 to vector<4x128xf32>
    %23 = arith.maximumf %22, %21 : vector<4x128xf32>
    %cst_7 = arith.constant dense<true> : vector<4x128xi1>
    %24 = arith.xori %7, %cst_7 : vector<4x128xi1>
    %25 = arith.andi %17, %24 : vector<4x128xi1>
    %cst_8 = arith.constant 0.000000e+00 : f32
    %26 = vector.broadcast %cst_8 : f32 to vector<4x128xf32>
    %27 = arith.select %25, %23, %26 : vector<4x128xi1>, vector<4x128xf32>
    %c0_9 = arith.constant 0 : index
    %c0_10 = arith.constant 0 : index
    %28 = memref.load %arg4[%c0_9, %c0_10] : memref<1x1xf32, #tpu.memory_space<smem>>
    %29 = vector.shape_cast %27 : vector<4x128xf32> to vector<1x4x128xf32>
    %cst_11 = arith.constant dense<0.000000e+00> : vector<1xf32>
    %30 = vector.multi_reduction <add>, %29, %cst_11 [1, 2] : vector<1x4x128xf32> to vector<1xf32>
    %31 = vector.shape_cast %30 : vector<1xf32> to vector<1x1x1xf32>
    %32 = vector.extract %31[0, 0, 0] : f32 from vector<1x1x1xf32>
    %33 = arith.addf %28, %32 : f32
    %c0_12 = arith.constant 0 : index
    %c0_13 = arith.constant 0 : index
    %34 = memref.load %arg4[%c0_12, %c0_13] : memref<1x1xf32, #tpu.memory_space<smem>>
    memref.store %33, %arg4[%c0_12, %c0_13] : memref<1x1xf32, #tpu.memory_space<smem>>
    %c0_i32_14 = arith.constant 0 : i32
    %35 = arith.cmpi eq, %arg0, %c0_i32_14 : i32
    %36 = arith.extui %35 : i1 to i32
    %c0_i32_15 = arith.constant 0 : i32
    %37 = arith.cmpi ne, %36, %c0_i32_15 : i32
    scf.if %37 {
      %c0_16 = arith.constant 0 : index
      %c0_17 = arith.constant 0 : index
      %38 = memref.load %arg4[%c0_16, %c0_17] : memref<1x1xf32, #tpu.memory_space<smem>>
      %cst_18 = arith.constant 6.000000e+00 : f32
      %39 = arith.divf %38, %cst_18 : f32
      %c0_19 = arith.constant 0 : index
      %c0_20 = arith.constant 0 : index
      %40 = memref.load %arg3[%c0_19, %c0_20] : memref<1x1xf32, #tpu.memory_space<smem>>
      memref.store %39, %arg3[%c0_19, %c0_20] : memref<1x1xf32, #tpu.memory_space<smem>>
    } else {
    }
    return
  }
  func.func @transform_0(%arg0: i32) -> (i32, i32) {
    %c0_i32 = arith.constant 0 : i32
    %c0_i32_0 = arith.constant 0 : i32
    return %c0_i32, %arg0 : i32, i32
  }
  func.func @transform_1(%arg0: i32) -> (i32, i32) {
    %c0_i32 = arith.constant 0 : i32
    %c0_i32_0 = arith.constant 0 : i32
    return %c0_i32, %arg0 : i32, i32
  }
  func.func @transform_2(%arg0: i32) -> (i32, i32) {
    %c0_i32 = arith.constant 0 : i32
    %c0_i32_0 = arith.constant 0 : i32
    %c0_i32_1 = arith.constant 0 : i32
    return %c0_i32, %c0_i32_0 : i32, i32
  }
}

</mosaic_0001>

<bundles_post_ra>
// kernel: tpu_custom_call.1
= control target key start
LH: loop header
LB: loop body
LE: loop exit
PB: predicated region body
PF: predicated region fallthrough
CT: control target
= control target key end

     0   :  { %7 = vsyncpa [#allocation4], 0  ;;  %s228_s0 = inlined_call_operand.hbm [shape: f32[4,128], index: 0, kind: input, shape index: {}]   ;;  %s229_s1 = inlined_call_operand.hbm [shape: s32[1,128], index: 1, kind: input, shape index: {}]   ;;  %s230_s2 = inlined_call_operand.hbm [shape: f32[1,1], index: 2, kind: output, shape index: {}]  }
   0x1   :  { %8 = vsyncpa [#allocation7], 0 }
   0x2   :  { %9 = vsyncpa [#allocation5], 0  ;;  %s15_s11 = sshll.u32 %s228_s0, 4  ;;  %s197_s12 = smov [#allocation3]   ;;  %s16_s11 = int_to_ptr.hbm [resolvable:$true] %s15_s11 }
   0x3   :  { %s17_s13 = sshll.u32 %s197_s12, 4  ;;  %s26_s16 = sshll.u32 %s229_s1, 4  ;;  %s18_s13 = int_to_ptr.vmem [resolvable:$true] %s17_s13  ;;  %s27_s16 = int_to_ptr.hbm [resolvable:$true] %s26_s16 }
   0x4   :  { %20 = dma.hbm_to_vmem [thread:$0]  %s16_s11, 64, %s18_s13, [#allocation4]  }
   0x5   :  { %s198_s17 = smov [#allocation6]  }
   0x6   :  { %s28_s18 = sshll.u32 %s198_s17, 4  ;;  %s29_s18 = int_to_ptr.vmem [resolvable:$true] %s28_s18 }
   0x7   :  { %31 = dma.hbm_to_vmem [thread:$0]  %s27_s16, 16, %s29_s18, [#allocation7]  }
   0x8   :  { %191 = dma.done.wait [#allocation4], 64  }
   0x9   :  { %192 = vsyncadd [#allocation4], 4294967232 }
   0xa   :  { %193 = dma.done.wait [#allocation7], 16  }
   0xb   :  { %194 = vsyncadd [#allocation7], 4294967280  ;;  %v48_v0 = vlaneseq  ;;  %v46_v2 = vld [vmem:[#allocation3] sm:$0xf]  ;;  %v128_v3 = vld [vmem:[#allocation6] ss:$0 sm:$0xff] }
   0xc   :  { %vm53_vm0 = vcmask 1043456   ;;  %v67_v12 = vadd.f32 1.0, %v46_v2  ;;  %vm199_vm3 = vmmov 1   ;;  %v200_v18 = vmov 6.0   ;;  %s107_s19 = sshll.u32 %s230_s2, 4  ;;  %s201_s23 = smov [#allocation8]   ;;  %s108_s19 = int_to_ptr.hbm [resolvable:$true] %s107_s19 }
   0xd   :  { %v49_v1 = vshrl.u32 %v48_v0, 7  ;;  %v62_v10 = vand.u32 127, %v48_v0  ;;  %129 = vrcp.f32 %v200_v18 }
   0xf   :  { %vm51_vm1 = vcmp.eq.s32.totalorder %v49_v1, %v128_v3  ;;  %vm66_vm2 = vcmp.lt.s32.totalorder %v62_v10, 2 }
  0x10   :  { %v52_v4 = vsel %vm51_vm1, %v46_v2, 0.0  ;;  %vm70_vm4 = vmxor %vm51_vm1, %vm199_vm3 }
  0x11   :  { %v54_v5 = vsel %vm53_vm0, %v52_v4, 0.0  ;;  %vm71_vm5 = vmand %vm66_vm2, %vm70_vm4 }
  0x12   :  { %v55_v6 = vrot.slane %v54_v5, 4 }
  0x13   :  { %v130_v19 = vpop.eup %129 }
  0x14   :  { %v56_v7 = vadd.f32 %v55_v6, %v54_v5  ;;  %v92_v20 = vmul.f32 6.0, %v130_v19  ;;  %vm96_vm6 = vweird.f32 %v130_v19 }
  0x16   :  { %v57_v8 = vrot.slane %v56_v7, 2  ;;  %v93_v21 = vsub.f32 1.0, %v92_v20 }
  0x18   :  { %v58_v9 = vadd.f32 %v57_v8, %v56_v7  ;;  %v94_v25 = vmul.f32 %v130_v19, %v93_v21 }
  0x1a   :  { %v59_v11 = vrot.slane %v58_v9, 1  ;;  %v95_v28 = vadd.f32 %v130_v19, %v94_v25 }
  0x1c   :  { %v60_v13 = vadd.f32 %v59_v11, %v58_v9  ;;  %v97_v31 = vsel %vm96_vm6, %v130_v19, %v95_v28 }
  0x1e   :  { %v68_v14 = vsub.f32 %v67_v12, %v60_v13 }
  0x20   :  { %v69_v15 = vmax.f32 %v68_v14, 0.0 }
  0x22   :  { %v72_v16 = vsel %vm71_vm5, %v69_v15, 0.0 }
  0x23   :  { %v74_v17 = vsel %vm53_vm0, %v72_v16, 0.0 }
  0x24   :  { %75 = vadd.xlane.f32.xlu0 %v74_v17 }
  0x97   :  { %v76_v22 = vpop.xlane.xlu0 %75 }
  0x98   :  { %v77_v23 = vrot.slane %v76_v22, 4 }
  0x9a   :  { %v78_v24 = vadd.f32 %v77_v23, %v76_v22 }
  0x9c   :  { %v79_v26 = vrot.slane %v78_v24, 2 }
  0x9e   :  { %v80_v27 = vadd.f32 %v79_v26, %v78_v24 }
  0xa0   :  { %v81_v29 = vrot.slane %v80_v27, 1 }
  0xa2   :  { %v82_v30 = vadd.f32 %v81_v29, %v80_v27 }
  0xa4   :  { %119 = vpush %v82_v30 }
  0xa5   :  { %121 = vpush %v97_v31 }
  0xd5   :  { %s120_s20 = spop %119 }
  0xd6   :  { %s122_s21 = spop %121 }
  0xd7   :  { %s99_s22 = smul.f32 %s122_s21, %s120_s20 }
  0xd9   :  { %101 = sst [smem:[#allocation8]] %s99_s22 }
  0xda   :  { %110 = dma.smem_to_hbm %s201_s23, 16, %s108_s19, [#allocation5]  }
  0xdb   :  { %195 = dma.done.wait [#allocation5], 16  }
  0xdc   :  { %196 = vsyncadd [#allocation5], 4294967280 }
  0xdd   :  { %115 = sfence }
  0xde   :  { %116 = vsyncpa [#allocation4], 1 }
  0xdf   :  { %117 = vsyncpa [#allocation7], 1 }
  0xe0   :  { %118 = vsyncpa [#allocation5], 1 }

</bundles_post_ra>
